<compile_context>
chip_gen: v7x
topology: tpu7x:2x2x1
jax: 0.10.0
libtpu: 0.0.40
codegen_flags: <defaults>
</compile_context>

<pallas_src>
import functools
import math

import jax
import jax.numpy as jnp
import numpy as np
from jax.experimental import pallas as pl
from jax.experimental.pallas import tpu as pltpu


def build_pe(max_seq_len: int, d_model: int) -> np.ndarray:
    """Positional-encoding buffer, exactly as in PositionalEncoder.__init__.

    Note: the module intentionally uses exponent 2*i for sin and 2*(i+1) for
    the paired cos (non-canonical but matches model_molo); kept verbatim.
    """
    assert d_model % 2 == 0, "d_model must be even (pe[pos, i+1] indexing)"
    pe = np.zeros((max_seq_len, d_model), dtype=np.float32)
    for pos in range(max_seq_len):
        for i in range(0, d_model, 2):
            pe[pos, i] = math.sin(pos / 10000 ** (2 * i / d_model))
            pe[pos, i + 1] = math.cos(pos / 10000 ** (2 * (i + 1) / d_model))
    return pe  # (max_seq_len, d_model)


def _choose_tiles(B, N, itemsize, target_bytes=4 * 1024 * 1024):
    """Pick (TB, TN).

    TN-first: prefer whole rows (TN == N) -> contiguous slabs + pe resident;
    otherwise TN is a large multiple of 128.  TB is then derived from the
    per-buffer byte budget (multiple of 8, or == B).  The caller uses a
    cdiv-padded grid, so neither tile has to divide the array extent.
    """
    target_elems = max(128, target_bytes // itemsize)
    min_rows = B if B <= 8 else 8
    row_budget = max(128, target_elems // min_rows)

    if N % 128 != 0 or N <= row_budget:
        TN = N                                   # whole contiguous rows
    else:
        TN = max(128, min(N // 128, row_budget // 128) * 128)

    rows = max(min_rows, target_elems // TN)
    if B <= 8 or rows >= B:
        TB = B
    else:
        TB = min((B // 8) * 8, (rows // 8) * 8)

    # v7x megacore: make sure at least one "parallel" axis has >= 2 blocks.
    if pl.cdiv(B, TB) * pl.cdiv(N, TN) == 1:
        if B > 8:
            TB = max(8, ((B // 2) // 8) * 8)
        elif N % 128 == 0 and N >= 256:
            TN = max(128, ((N // 2) // 128) * 128)
    return TB, TN


def _pe_eval_kernel(x_ref, pe_ref, o_ref, *, scale, b_scale):
    # x_ref: (TB, TN); pe_ref: (1, TN) f32 -- broadcast add over batch rows.
    xf = x_ref[...].astype(jnp.float32)
    pf = pe_ref[...]
    o_ref[...] = (xf * scale + b_scale * pf).astype(o_ref.dtype)


def _pe_train_kernel(x_ref, pe_ref, m_ref, o_ref, *, scale, b_scale):
    # scale / b_scale already include the 1/keep_prob inverted-dropout factor;
    # m_ref holds the precomputed 0/1 keep mask in x.dtype.
    xf = x_ref[...].astype(jnp.float32)
    pf = pe_ref[...]
    mf = m_ref[...].astype(jnp.float32)
    o_ref[...] = ((xf * scale + b_scale * pf) * mf).astype(o_ref.dtype)


def positional_encoder(x, pe_full, *, d_model, A_scale=10.0, B_scale=1.0,
                       dropout=0.1, training=False, rng_key=None):
    """x: (B, S, D); pe_full: (max_seq_len, D). Returns (B, S, D) in x.dtype."""
    B, S, D = x.shape
    assert D == d_model
    scale = float(math.sqrt(d_model / A_scale))
    b_scale = float(B_scale)

    # Lane-dense 2-D view: (B, S, D) -> (B, S*D); pe stays float32.
    N = S * D
    x2 = x.reshape(B, N)
    pe2 = pe_full[:S, :].astype(jnp.float32).reshape(1, N)

    itemsize = jnp.dtype(x.dtype).itemsize
    TB, TN = _choose_tiles(B, N, itemsize)
    grid = (pl.cdiv(N, TN), pl.cdiv(B, TB))     # n outer, b inner (pe constant
                                                # along the inner axis)

    cparams = pltpu.CompilerParams(
        dimension_semantics=("parallel", "parallel"),
        vmem_limit_bytes=48 * 1024 * 1024,
    )
    out_shape = jax.ShapeDtypeStruct((B, N), x.dtype)
    x_spec = pl.BlockSpec((TB, TN), lambda n, b: (b, n))
    pe_spec = pl.BlockSpec((1, TN), lambda n, b: (0, n))
    out_spec = pl.BlockSpec((TB, TN), lambda n, b: (b, n))

    if not training or dropout == 0.0:
        kernel = functools.partial(_pe_eval_kernel, scale=scale, b_scale=b_scale)
        out2 = pl.pallas_call(
            kernel,
            out_shape=out_shape,
            grid_spec=pltpu.PrefetchScalarGridSpec(
                num_scalar_prefetch=0,
                grid=grid,
                in_specs=[x_spec, pe_spec],
                out_specs=out_spec,
            ),
            compiler_params=cparams,
        )(x2, pe2)
        return out2.reshape(B, S, D)

    # Training: inverted dropout with 1/keep_prob folded into the constants.
    if rng_key is None:
        rng_key = jax.random.PRNGKey(0)
    keep_prob = 1.0 - float(dropout)
    keep = jax.random.bernoulli(rng_key, keep_prob, (B, N)).astype(x.dtype)
    scale_t = scale / keep_prob
    b_scale_t = b_scale / keep_prob

    kernel = functools.partial(_pe_train_kernel, scale=scale_t, b_scale=b_scale_t)
    out2 = pl.pallas_call(
        kernel,
        out_shape=out_shape,
        grid_spec=pltpu.PrefetchScalarGridSpec(
            num_scalar_prefetch=0,
            grid=grid,
            in_specs=[x_spec, pe_spec, x_spec],
            out_specs=out_spec,
        ),
        compiler_params=cparams,
    )(x2, pe2, keep)
    return out2.reshape(B, S, D)


if __name__ == "__main__":
    # Small shapes consistent with the module: batch=2, seq=8, d_model=32.
    d_model = 32
    max_seq_len = 20
    A_scale, B_scale = 10.0, 1.0
    Bsz, S = 2, 8
    dropout = 0.1

    key = jax.random.PRNGKey(0)
    kx, kdrop = jax.random.split(key)
    x = jax.random.normal(kx, (Bsz, S, d_model), dtype=jnp.float32)
    pe_full = jnp.asarray(build_pe(max_seq_len, d_model))

    # --- eval mode (dropout = identity): exact reference check -------------
    out = positional_encoder(x, pe_full, d_model=d_model, A_scale=A_scale,
                             B_scale=B_scale, dropout=dropout, training=False)
    out = jax.block_until_ready(out)
    ref = (np.asarray(x) * math.sqrt(d_model / A_scale)
           + B_scale * np.asarray(pe_full)[:S][None, :, :])
    np.testing.assert_allclose(np.asarray(out), ref, rtol=1e-6, atol=1e-6)

    # --- training mode: kept elements must equal ref / keep_prob -----------
    # TODO(synk): dropout mask comes from jax.random (cannot bit-match torch's
    # RNG stream); the inverted-dropout semantics/statistics match.
    out_tr = positional_encoder(x, pe_full, d_model=d_model, A_scale=A_scale,
                                B_scale=B_scale, dropout=dropout,
                                training=True, rng_key=kdrop)
    out_tr = jax.block_until_ready(out_tr)
    out_tr_np = np.asarray(out_tr)
    kept = out_tr_np != 0.0
    assert kept.any(), "dropout removed every element (unexpected)"
    np.testing.assert_allclose(out_tr_np[kept], (ref / (1.0 - dropout))[kept],
                               rtol=1e-5, atol=1e-5)

    print("KERNEL_OK")
</pallas_src>

<mosaic_0001>
module attributes {stable_mosaic.version = 11 : i64} {
  func.func @_pe_eval_kernel(%arg0: i32, %arg1: i32, %arg2: memref<2x128xf32, #tpu.memory_space<vmem>>, %arg3: memref<1x128xf32, #tpu.memory_space<vmem>>, %arg4: memref<2x128xf32, #tpu.memory_space<vmem>>) attributes {dimension_semantics = [#tpu.dimension_semantics<parallel>, #tpu.dimension_semantics<parallel>], iteration_bounds = array<i64: 2, 1>, scalar_prefetch = 0 : i64, scratch_operands = 0 : i64, tpu.core_type = #tpu.core_type<tc>, window_params = [{transform_indices = @transform_0, window_bounds = array<i64: 2, 128>}, {transform_indices = @transform_1, window_bounds = array<i64: 1, 128>}, {transform_indices = @transform_2, window_bounds = array<i64: 2, 128>}]} {
    %c0 = arith.constant 0 : index
    %c0_0 = arith.constant 0 : index
    %0 = vector.load %arg2[%c0, %c0_0] : memref<2x128xf32, #tpu.memory_space<vmem>>, vector<2x128xf32>
    %c0_1 = arith.constant 0 : index
    %c0_2 = arith.constant 0 : index
    %1 = vector.load %arg3[%c0_1, %c0_2] : memref<1x128xf32, #tpu.memory_space<vmem>>, vector<1x128xf32>
    %cst = arith.constant 1.78885436 : f32
    %2 = vector.broadcast %cst : f32 to vector<2x128xf32>
    %3 = arith.mulf %0, %2 : vector<2x128xf32>
    %cst_3 = arith.constant 1.000000e+00 : f32
    %4 = vector.broadcast %cst_3 : f32 to vector<1x128xf32>
    %5 = arith.mulf %4, %1 : vector<1x128xf32>
    %6 = vector.broadcast %5 : vector<1x128xf32> to vector<2x128xf32>
    %7 = arith.addf %3, %6 : vector<2x128xf32>
    %c0_4 = arith.constant 0 : index
    %c0_5 = arith.constant 0 : index
    %8 = vector.load %arg4[%c0_4, %c0_5] : memref<2x128xf32, #tpu.memory_space<vmem>>, vector<2x128xf32>
    tpu.vector_store %arg4[%c0_4, %c0_5], %7 {strides = array<i32>} : memref<2x128xf32, #tpu.memory_space<vmem>>, vector<2x128xf32>,
    return
  }
  func.func @transform_0(%arg0: i32, %arg1: i32) -> (i32, i32) {
    %c0_i32 = arith.constant 0 : i32
    return %arg1, %arg0 : i32, i32
  }
  func.func @transform_1(%arg0: i32, %arg1: i32) -> (i32, i32) {
    %c0_i32 = arith.constant 0 : i32
    %c0_i32_0 = arith.constant 0 : i32
    return %c0_i32, %arg0 : i32, i32
  }
  func.func @transform_2(%arg0: i32, %arg1: i32) -> (i32, i32) {
    %c0_i32 = arith.constant 0 : i32
    return %arg1, %arg0 : i32, i32
  }
}

</mosaic_0001>

<bundles_post_ra>
// kernel: tpu_custom_call.1
= control target key start
LH: loop header
LB: loop body
LE: loop exit
PB: predicated region body
PF: predicated region fallthrough
CT: control target
= control target key end

     0   :  { %7 = vsyncpa [#allocation3], 0  ;;  %s693_s0 = inlined_call_operand.hbm [shape: f32[2,256], index: 0, kind: input, shape index: {}]   ;;  %s694_s1 = inlined_call_operand.vmem [shape: f32[1,256], index: 1, kind: input, shape index: {}]   ;;  %s695_s2 = inlined_call_operand.hbm [shape: f32[2,256], index: 2, kind: output, shape index: {}]  }
   0x1   :  { %9 = vsyncpa [#allocation3 + $0x1], 0 }
   0x2   :  { %10 = vsyncpa [#allocation4], 0 }
   0x3   :  { %12 = vsyncpa [#allocation4 + $0x1], 0  ;;  %s516_s9 = smov 0   ;;  %s518_s10 = smov 0  }
   0x4   :  { %s520_s11 = smov 0   ;;  %s522_s12 = smov 0  }
   0x5   :  { %s524_s13 = smov 0   ;;  %s526_s14 = smov 0  }
   0x6 LB: > { %s309_s15 = sadd.s32 4294967295, %s497_s14   ;;  %s310_s16 = sadd.s32 4294967294, %s497_s14   ;;  %s497_s14 = sphi %s526_s14, %s18_s14   ;;  %s493_s13 = sphi %s524_s13, %s711_s13   ;;  %s489_s12 = sphi %s522_s12, %s710_s12   ;;  %s485_s11 = sphi %s520_s11, %s709_s11   ;;  %s481_s10 = sphi %s518_s10, %s708_s10   ;;  %s477_s9 = sphi %s516_s9, %s707_s9  }
   0x7   : > { %s30_s17 = sadd.s32 1, %s493_s13  ;;  %s39_s18 = sadd.s32 1, %s485_s11 }
   0x8   : > { %p32_p0 = scmp.ge.s32.totalorder %s30_s17, 2  ;;  %p46_p1 = scmp.ne.s32.totalorder %s485_s11, %s481_s10 }
   0x9   : > { %p47_p2 = scmp.eq.s32.totalorder %s497_s14, 0  ;;  %p52_p3 = scmp.ne.s32.totalorder %s481_s10, %s477_s9 }
   0xa   : > { %s713_s17 = smov (%p32_p0, %s30_s17), 0  ;;  %p53_p5 = scmp.eq.s32.totalorder %s309_s15, 0 }
   0xb   : > { %p557_p4 = por %p47_p2, %p46_p1  ;;  %s35_s20 = ssub.s32 %s493_s13, %s713_s17 }
   0xc   : > { %p104_p6 = scmp.eq.s32.totalorder %s309_s15, 1  ;;  %p37_p7 = scmp.eq.s32.totalorder %s35_s20, 0 }
   0xd   : > { %p563_p8 = por %p53_p5, %p52_p3  ;;  %p110_p10 = scmp.eq.s32.totalorder %s310_s16, 1 }
   0xe   : > { %p567_p9 = por %p104_p6, %p46_p1  ;;  %p335_p13 = scmp.lt.s32.totalorder %s497_s14, 2 }
   0xf   : > { %s572_s23 = scalar_select %p37_p7, %s485_s11, %s39_s18  }
  0x10   : > { %s699_s22 = scalar_select %p567_p9, 1, 0 }
  0x11   : > { %p574_p11 = por %p110_p10, %p52_p3  ;;  %s130_s25 = sand.u32 1, %s485_s11  }
  0x12   : > { %s313_s26 = sshll.u32 %s130_s25, 1  ;;  %s314_s27 = sshll.u32 %s493_s13, 5 }
  0x13   : > { %s700_s24 = scalar_select %p574_p11, 1, 0 }
  0x14   : > { %s585_s30 = scalar_lea.hbm %s693_s0, %s314_s27  ;;  %s134_s3 = scalar_lea.vmem [#allocation2], %s313_s26 }
  0x15   : > { %s143_s4 = sshll.u32 %s134_s3, 4  ;;  %p591_p0 = pnand %p335_p13, %p557_p4  ;;  %s587_s4 = int_to_ptr.vmem [resolvable:$true] %s143_s4 }
  0x16   : > { %s131_s6 = scalar_lea.sflag [#allocation3], %s130_s25  ;;  %s385_s7 = scalar_lea.hbm %s585_s30, 32 }
  0x17   : > { %p386_p3 = scmp.ne.s32.totalorder %s585_s30, %s385_s7  ;;  %p387_p5 = pneg %p591_p0 }
  0x18   : > { %s390_s16 = scalar_lea.hbm %s693_s0, 64  ;;  %p391_p4 = scmp.lt.u32.totalorder %s585_s30, %s693_s0 }
  0x19   : > { %p388_p6 = pnand %p387_p5, %p386_p3  ;;  %p392_p10 = scmp.lt.u32.totalorder %s390_s16, %s385_s7 }
  0x1a   : > { %p394_p12 = scmp.lt.u32.totalorder %s385_s7, %s585_s30 }
  0x1b   : > { %p389_p7 = pneg %p388_p6  ;;  %p393_p13 = por %p392_p10, %p391_p4 }
  0x1d   : > { %p395_p1 = por %p394_p12, %p393_p13 }
  0x1f   : > { %p396_p2 = pnand %p395_p1, %p389_p7 }
  0x21   : > { %399 = shalt.err (!%p396_p2)
}
  0x22   : > { %s400_s20 = scalar_lea.vmem %s587_s4, 32  ;;  %s499_s25 = smov [#allocation2]  }
  0x23   : > { %p401_p3 = scmp.ne.s32.totalorder %s587_s4, %s400_s20  ;;  %s405_s26 = sshll.u32 %s499_s25, 4  ;;  %s406_s26 = int_to_ptr.vmem [resolvable:$false] %s405_s26 }
  0x24   : > { %s407_s27 = scalar_lea.vmem %s406_s26, 64  ;;  %p408_p9 = scmp.lt.s32.totalorder %s587_s4, %s406_s26 }
  0x25   : > { %p403_p6 = pnand %p401_p3, %p387_p5  ;;  %p409_p4 = scmp.lt.s32.totalorder %s407_s27, %s400_s20 }
  0x27   : > { %p404_p11 = pneg %p403_p6  ;;  %p410_p10 = por %p409_p4, %p408_p9 }
  0x29   : > { %p411_p12 = pnand %p410_p10, %p404_p11 }
  0x2b   : > { %414 = shalt.err (!%p411_p12)
}
  0x2c   : > { %330 = dma.hbm_to_vmem [thread:$0]  (!%p591_p0), %s585_s30, 32, %s587_s4, %s131_s6  }
  0x2d   : > { %p702_p1 = scmp.lt.s32.totalorder %s497_s14, 3  ;;  %p703_p2 = scmp.ge.s32.totalorder %s497_s14, 1 }
  0x2f   : > { %p155_p5 = pnand %p703_p2, %p702_p1 }
  0x30   : > { %s627_s28 = sand.u32 (!%p155_p5), 1, %s481_s10  }
  0x31   : > { %158 = sbr.rel (%p155_p5) target bundleno = 85 (0x55), region = 28  ;;  %s316_s29 = sshll.u32 (!%p155_p5), %s627_s28, 1 }
  0x32   : > { %s161_s3 = scalar_lea.sflag (!%p155_p5), [#allocation3], %s627_s28  ;;  %s164_s7 = scalar_lea.vmem (!%p155_p5), [#allocation2], %s316_s29 }
  0x38   : > { %468 = dma.done.wait (%p563_p8), %s161_s3, 32  }
  0x39   : > { %470 = vsyncadd (%p563_p8), %s161_s3, 4294967264  ;;  %p188_p9 = scmp.lt.s32.totalorder %s489_s12, 1  ;;  %v191_v0 = vld [vmem:[%s164_s7] sm:$0x3]  ;;  %s187_s8 = scalar_lea.vmem [#allocation5], %s316_s29 }
  0x3a   : > { %s218_s15 = sshll.u32 %s187_s8, 4  ;;  %s320_s16 = sshll.u32 %s489_s12, 5  ;;  %v193_v2 = vmul.f32 1.7888544, %v191_v0  ;;  %s641_s15 = int_to_ptr.vmem [resolvable:$true] %s218_s15 }
  0x3b   : > { %s189_s30 = scalar_select %p188_p9, %s489_s12, 1 }
  0x3c   : > { %s646_s19 = scalar_lea.hbm %s695_s2, %s320_s16  ;;  %s203_s20 = scalar_lea.sflag [#allocation4], %s627_s28 }
  0x3d   : > { %s190_s6 = scalar_lea.vmem %s694_s1, %s189_s30  ;;  %s415_s25 = scalar_lea.vmem %s641_s15, 32 }
  0x3e   : > { %v318_v1 = vld [vmem:[%s190_s6] ss:$0 sm:$0xff]  ;;  %p416_p8 = scmp.ne.s32.totalorder %s641_s15, %s415_s25  ;;  %p704_p11 = scmp.ne.s32.totalorder %s699_s22, 0 }
  0x3f   : > { %v200_v3 = vadd.f32 %v318_v1, %v193_v2  ;;  %s500_s12 = smov [#allocation5]  }
  0x40   : > { %p417_p0 = pnand %p416_p8, %p704_p11  ;;  %s419_s26 = sshll.u32 %s500_s12, 4  ;;  %s420_s26 = int_to_ptr.vmem [resolvable:$false] %s419_s26 }
  0x41   : > { %201 = vst [vmem:[%s187_s8] sm:$0x3] %v200_v3  ;;  %s421_s27 = scalar_lea.vmem %s420_s26, 64  ;;  %p422_p13 = scmp.lt.s32.totalorder %s641_s15, %s420_s26 }
  0x42   : > { %p418_p7 = pneg %p417_p0  ;;  %p423_p3 = scmp.lt.s32.totalorder %s421_s27, %s415_s25 }
  0x44   : > { %p424_p6 = por %p423_p3, %p422_p13 }
  0x46   : > { %p425_p4 = pnand %p424_p6, %p418_p7 }
  0x48   : > { %428 = shalt.err (!%p425_p4)
}
  0x49   : > { %s429_s28 = scalar_lea.hbm %s646_s19, 32  ;;  %s433_s7 = scalar_lea.hbm %s695_s2, 64 }
  0x4a   : > { %p430_p10 = scmp.ne.s32.totalorder %s646_s19, %s429_s28  ;;  %p434_p2 = scmp.lt.u32.totalorder %s646_s19, %s695_s2 }
  0x4b   : > { %p435_p5 = scmp.lt.u32.totalorder %s433_s7, %s429_s28  ;;  %p437_p8 = scmp.lt.u32.totalorder %s429_s28, %s646_s19 }
  0x4c   : > { %p431_p12 = pnand %p430_p10, %p704_p11 }
  0x4d   : > { %p436_p9 = por %p435_p5, %p434_p2 }
  0x4e   : > { %p432_p1 = pneg %p431_p12 }
  0x4f   : > { %p438_p0 = por %p437_p8, %p436_p9 }
  0x51   : > { %p439_p7 = pnand %p438_p0, %p432_p1 }
  0x53   : > { %442 = shalt.err (!%p439_p7)
}
  0x54   : > { %325 = dma.vmem_to_hbm [thread:$0]  (%p704_p11), %s641_s15, 32, %s646_s19, %s203_s20  }
  0x55 PF: > { %s230_s5 = sand.u32 1, %s477_s9   ;;  %p705_p13 = scmp.ne.s32.totalorder %s700_s24, 0 }
  0x56   : > { %p706_p3 = scmp.ge.s32.totalorder %s497_s14, 2  ;;  %s231_s6 = scalar_lea.sflag [#allocation4], %s230_s5 }
  0x58   : > { %p332_p6 = pnand %p706_p3, %p705_p13 }
  0x5a   : > { %472 = dma.done.wait (!%p332_p6), %s231_s6, 32  }
  0x5b   : > { %474 = vsyncadd (!%p332_p6), %s231_s6, 4294967264  ;;  %s18_s14 = sadd.s32 1, %s497_s14   ;;  %s707_s9 = smov %s481_s10 }
  0x5c   : > { %p15_p4 = scmp.ge.s32.totalorder %s18_s14, 4   ;;  %s708_s10 = smov %s485_s11 }
  0x5d   : > { %s709_s11 = smov %s572_s23  ;;  %s710_s12 = smov %s493_s13 }
  0x5e   : > { %s711_s13 = smov %s713_s17  ;;  %17 = sbr.rel (!%p15_p4) target bundleno = 6 (0x6), region = 76 }
  0x65   :  { %236 = vsyncpa [#allocation3], 1 }
  0x66   :  { %238 = vsyncpa [#allocation3 + $0x1], 1 }
  0x67   :  { %239 = vsyncpa [#allocation4], 1 }
  0x68   :  { %241 = vsyncpa [#allocation4 + $0x1], 1 }

</bundles_post_ra>
